<compile_context>
chip_gen: v5e
topology: v5e:2x2
jax: 0.10.0
libtpu: 0.0.40
codegen_flags: <defaults>
</compile_context>

<pallas_src>
import jax
import jax.numpy as jnp
from jax.experimental import pallas as pl
from jax.experimental.pallas import tpu as pltpu


def _round_up(n, m):
    return ((n + m - 1) // m) * m


def _random_model_kernel(x_ref, p_ref, r_ref, o_ref):
    # t = x @ p   (small-LHS MXU pass, f32 accumulate)
    t = jnp.dot(x_ref[...], p_ref[...], preferred_element_type=jnp.float32)
    # out = t @ r
    o_ref[...] = jnp.dot(
        t.astype(r_ref.dtype), r_ref[...], preferred_element_type=jnp.float32
    ).astype(o_ref.dtype)


def random_model_forward(x, p, r, *, tb_max=512):
    """x: (B, K) f32, p: (K, K) f32, r: (K, K) f32 -> (B, K) f32 = x @ (p @ r)."""
    B, K = x.shape
    assert p.shape == (K, K) and r.shape == (K, K)

    # Lane-dense padding of the feature dim; sublane-friendly batch tiling.
    Kp = _round_up(K, 128)
    B8 = _round_up(B, 8)
    TB = min(tb_max, B8)
    B_pad = _round_up(B8, TB)

    xp = jnp.zeros((B_pad, Kp), x.dtype).at[:B, :K].set(x)
    pp = jnp.zeros((Kp, Kp), p.dtype).at[:K, :K].set(p)
    rp = jnp.zeros((Kp, Kp), r.dtype).at[:K, :K].set(r)

    itemsize = jnp.dtype(x.dtype).itemsize
    cost = pl.CostEstimate(
        flops=4 * B * K * K,                       # two B x K x K matmuls
        transcendentals=0,
        bytes_accessed=(2 * B * K + 2 * K * K) * itemsize,
    )

    out_pad = pl.pallas_call(
        _random_model_kernel,
        out_shape=jax.ShapeDtypeStruct((B_pad, Kp), x.dtype),
        grid=(B_pad // TB,),
        in_specs=[
            pl.BlockSpec((TB, Kp), lambda i: (i, 0)),   # x tile
            pl.BlockSpec((Kp, Kp), lambda i: (0, 0)),   # p resident
            pl.BlockSpec((Kp, Kp), lambda i: (0, 0)),   # r resident
        ],
        out_specs=pl.BlockSpec((TB, Kp), lambda i: (i, 0)),
        compiler_params=pltpu.CompilerParams(
            dimension_semantics=("parallel",),
        ),
        cost_estimate=cost,
    )(xp, pp, rp)

    return out_pad[:B, :K]


if __name__ == "__main__":
    key = jax.random.PRNGKey(0)
    k_x, k_p, k_r = jax.random.split(key, 3)

    B, K = 8, 100  # small batch; module fixes the feature dim at 100

    x = jax.random.normal(k_x, (B, K), dtype=jnp.float32)
    # deterministic "parameter" init (stands in for nn.Parameter(torch.randn(100,100)))
    p = jax.random.normal(k_p, (K, K), dtype=jnp.float32)
    # deterministic stand-in for the forward-pass torch.randn(100, 100)
    # TODO(synk): torch RNG stream is not bit-reproducible in JAX; distributional
    # semantics (fresh standard-normal 100x100) are preserved instead.
    r = jax.random.normal(k_r, (K, K), dtype=jnp.float32)

    out = random_model_forward(x, p, r)
    out = jax.block_until_ready(out)

    # correctness check against plain-JAX reference (module's association order)
    ref = x @ (p @ r)
    assert out.shape == (B, K)
    assert jnp.allclose(out, ref, rtol=1e-4, atol=1e-3), "mismatch vs reference"

    print("KERNEL_OK")
</pallas_src>

<mosaic_0001>
module attributes {stable_mosaic.version = 11 : i64} {
  func.func @_random_model_kernel(%arg0: i32, %arg1: memref<8x128xf32, #tpu.memory_space<vmem>>, %arg2: memref<128x128xf32, #tpu.memory_space<vmem>>, %arg3: memref<128x128xf32, #tpu.memory_space<vmem>>, %arg4: memref<8x128xf32, #tpu.memory_space<vmem>>) attributes {dimension_semantics = [#tpu.dimension_semantics<parallel>], iteration_bounds = array<i64: 1>, scalar_prefetch = 0 : i64, scratch_operands = 0 : i64, tpu.core_type = #tpu.core_type<tc>, window_params = [{transform_indices = @transform_0, window_bounds = array<i64: 8, 128>}, {pipeline_mode = #tpu.pipeline_mode<synchronous>, transform_indices = @transform_1, window_bounds = array<i64: 128, 128>}, {pipeline_mode = #tpu.pipeline_mode<synchronous>, transform_indices = @transform_2, window_bounds = array<i64: 128, 128>}, {transform_indices = @transform_3, window_bounds = array<i64: 8, 128>}]} {
    %c0 = arith.constant 0 : index
    %c0_0 = arith.constant 0 : index
    %0 = vector.load %arg1[%c0, %c0_0] : memref<8x128xf32, #tpu.memory_space<vmem>>, vector<8x128xf32>
    %c0_1 = arith.constant 0 : index
    %c0_2 = arith.constant 0 : index
    %1 = vector.load %arg2[%c0_1, %c0_2] : memref<128x128xf32, #tpu.memory_space<vmem>>, vector<128x128xf32>
    %cst = arith.constant dense<0.000000e+00> : vector<8x128xf32>
    %2 = tpu.matmul %0, %1, %cst {dimension_numbers = #tpu.dot_dimension_numbers<[1], [0], [0], [1], [0, 0, 1, 1], [], []>} : vector<8x128xf32>, vector<128x128xf32>, vector<8x128xf32> -> vector<8x128xf32>
    %c0_3 = arith.constant 0 : index
    %c0_4 = arith.constant 0 : index
    %3 = vector.load %arg3[%c0_3, %c0_4] : memref<128x128xf32, #tpu.memory_space<vmem>>, vector<128x128xf32>
    %cst_5 = arith.constant dense<0.000000e+00> : vector<8x128xf32>
    %4 = tpu.matmul %2, %3, %cst_5 {dimension_numbers = #tpu.dot_dimension_numbers<[1], [0], [0], [1], [0, 0, 1, 1], [], []>} : vector<8x128xf32>, vector<128x128xf32>, vector<8x128xf32> -> vector<8x128xf32>
    %c0_6 = arith.constant 0 : index
    %c0_7 = arith.constant 0 : index
    %5 = vector.load %arg4[%c0_6, %c0_7] : memref<8x128xf32, #tpu.memory_space<vmem>>, vector<8x128xf32>
    tpu.vector_store %arg4[%c0_6, %c0_7], %4 {strides = array<i32>} : memref<8x128xf32, #tpu.memory_space<vmem>>, vector<8x128xf32>,
    return
  }
  func.func @transform_0(%arg0: i32) -> (i32, i32) {
    %c0_i32 = arith.constant 0 : i32
    %c0_i32_0 = arith.constant 0 : i32
    return %arg0, %c0_i32 : i32, i32
  }
  func.func @transform_1(%arg0: i32) -> (i32, i32) {
    %c0_i32 = arith.constant 0 : i32
    %c0_i32_0 = arith.constant 0 : i32
    %c0_i32_1 = arith.constant 0 : i32
    return %c0_i32, %c0_i32_0 : i32, i32
  }
  func.func @transform_2(%arg0: i32) -> (i32, i32) {
    %c0_i32 = arith.constant 0 : i32
    %c0_i32_0 = arith.constant 0 : i32
    %c0_i32_1 = arith.constant 0 : i32
    return %c0_i32, %c0_i32_0 : i32, i32
  }
  func.func @transform_3(%arg0: i32) -> (i32, i32) {
    %c0_i32 = arith.constant 0 : i32
    %c0_i32_0 = arith.constant 0 : i32
    return %arg0, %c0_i32 : i32, i32
  }
}

</mosaic_0001>

<bundles_post_ra>
// kernel: tpu_custom_call.1
= control target key start
LH: loop header
LB: loop body
LE: loop exit
PB: predicated region body
PF: predicated region fallthrough
CT: control target
= control target key end

     0   :  { %8 = vsyncpa [#allocation3], 0  ;;  %s298_s0 = inlined_call_operand.hbm [shape: f32[8,128], index: 0, kind: input, shape index: {}]   ;;  %s299_s1 = inlined_call_operand.hbm [shape: f32[128,128], index: 1, kind: input, shape index: {}]   ;;  %s300_s2 = inlined_call_operand.hbm [shape: f32[128,128], index: 2, kind: input, shape index: {}]   ;;  %s301_s3 = inlined_call_operand.hbm [shape: f32[8,128], index: 3, kind: output, shape index: {}]  }
   0x1   :  { %9 = vsyncpa [#allocation6], 0  ;;  %s26_s14 = sshll.u32 %s299_s1, 4  ;;  %s27_s14 = int_to_ptr.hbm [resolvable:$true] %s26_s14 }
   0x2   :  { %10 = vsyncpa [#allocation4], 0  ;;  %s260_s15 = smov [#allocation5]   ;;  %s16_s19 = sshll.u32 %s298_s0, 4  ;;  %s17_s19 = int_to_ptr.hbm [resolvable:$true] %s16_s19 }
   0x3   :  { %s28_s16 = sshll.u32 %s260_s15, 4  ;;  %s261_s20 = smov 128   ;;  %s29_s16 = int_to_ptr.vmem [resolvable:$true] %s28_s16 }
   0x4   :  { %s262_s21 = smov 8   ;;  %s263_s22 = smov [#allocation2]  }
   0x5   :  { %34 = dma.hbm_to_vmem [thread:$0]  %s27_s14, 2048, %s29_s16, [#allocation6], %s261_s20, %s261_s20, %s262_s21  }
   0x6   :  { %s18_s23 = sshll.u32 %s263_s22, 4  ;;  %s39_s26 = sshll.u32 %s300_s2, 4  ;;  %s19_s23 = int_to_ptr.vmem [resolvable:$true] %s18_s23  ;;  %s40_s26 = int_to_ptr.hbm [resolvable:$true] %s39_s26 }
   0x7   :  { %21 = dma.hbm_to_vmem [thread:$0]  %s17_s19, 128, %s19_s23, [#allocation3]  }
   0x8   :  { %s264_s1 = smov [#allocation7]  }
   0x9   :  { %s41_s27 = sshll.u32 %s264_s1, 4  ;;  %s42_s27 = int_to_ptr.vmem [resolvable:$true] %s41_s27 }
   0xa   :  { %47 = dma.hbm_to_vmem [thread:$0]  %s40_s26, 2048, %s42_s27, [#allocation6], %s261_s20, %s261_s20, %s262_s21  }
   0xb   :  { %254 = dma.done.wait [#allocation3], 128  }
   0xc   :  { %255 = vsyncadd [#allocation3], 4294967168 }
   0xd   :  { %256 = dma.done.wait [#allocation6], 4096  }
   0xe   :  { %257 = vsyncadd [#allocation6], 4294963200  ;;  %v76_v0 = vld [vmem:[#allocation5 + $0x78] sm:$0xff]  ;;  %v75_v1 = vld [vmem:[#allocation5 + $0x70] sm:$0xff]  ;;  %s265_s0 = smov [#allocation8]   ;;  %s141_s30 = sshll.u32 %s301_s3, 4  ;;  %s142_s30 = int_to_ptr.hbm [resolvable:$true] %s141_s30 }
   0xf   :  { %77 = vmatpush.msra.mxu0 %v76_v0  ;;  %v74_v2 = vld [vmem:[#allocation5 + $0x68] sm:$0xff]  ;;  %v73_v3 = vld [vmem:[#allocation5 + $0x60] sm:$0xff]  ;;  %v112_v4 = vld [vmem:[#allocation7 + $0x78] sm:$0xff]  ;;  %s139_s2 = sshll.u32 %s265_s0, 4  ;;  %s140_s2 = int_to_ptr.vmem [resolvable:$true] %s139_s2 }
  0x10   :  { %v72_v5 = vld [vmem:[#allocation5 + $0x58] sm:$0xff]  ;;  %113 = vmatpush.msra.mxu1 %v112_v4  ;;  %v111_v6 = vld [vmem:[#allocation7 + $0x70] sm:$0xff]  ;;  %v110_v7 = vld [vmem:[#allocation7 + $0x68] sm:$0xff] }
  0x11   :  { %78 = vmatpush.msra.mxu0 %v75_v1  ;;  %v71_v8 = vld [vmem:[#allocation5 + $0x50] sm:$0xff]  ;;  %v109_v9 = vld [vmem:[#allocation7 + $0x60] sm:$0xff]  ;;  %v70_v10 = vld [vmem:[#allocation5 + $0x48] sm:$0xff] }
  0x12   :  { %114 = vmatpush.msra.mxu1 %v111_v6  ;;  %v108_v11 = vld [vmem:[#allocation7 + $0x58] sm:$0xff]  ;;  %v69_v12 = vld [vmem:[#allocation5 + $0x40] sm:$0xff]  ;;  %v107_v13 = vld [vmem:[#allocation7 + $0x50] sm:$0xff] }
  0x13   :  { %79 = vmatpush.msra.mxu0 %v74_v2  ;;  %v68_v14 = vld [vmem:[#allocation5 + $0x38] sm:$0xff]  ;;  %v106_v15 = vld [vmem:[#allocation7 + $0x48] sm:$0xff]  ;;  %v67_v16 = vld [vmem:[#allocation5 + $0x30] sm:$0xff] }
  0x14   :  { %115 = vmatpush.msra.mxu1 %v110_v7  ;;  %v105_v17 = vld [vmem:[#allocation7 + $0x40] sm:$0xff]  ;;  %v66_v18 = vld [vmem:[#allocation5 + $0x28] sm:$0xff]  ;;  %v104_v19 = vld [vmem:[#allocation7 + $0x38] sm:$0xff] }
  0x15   :  { %80 = vmatpush.msra.mxu0 %v73_v3  ;;  %v65_v20 = vld [vmem:[#allocation5 + $0x20] sm:$0xff]  ;;  %v103_v21 = vld [vmem:[#allocation7 + $0x30] sm:$0xff]  ;;  %v64_v22 = vld [vmem:[#allocation5 + $0x18] sm:$0xff] }
  0x16   :  { %116 = vmatpush.msra.mxu1 %v109_v9  ;;  %v102_v23 = vld [vmem:[#allocation7 + $0x28] sm:$0xff]  ;;  %v63_v24 = vld [vmem:[#allocation5 + $0x10] sm:$0xff]  ;;  %v101_v25 = vld [vmem:[#allocation7 + $0x20] sm:$0xff] }
  0x17   :  { %81 = vmatpush.msra.mxu0 %v72_v5  ;;  %v62_v26 = vld [vmem:[#allocation5 + $0x8] sm:$0xff]  ;;  %v100_v27 = vld [vmem:[#allocation7 + $0x18] sm:$0xff]  ;;  %v61_v28 = vld [vmem:[#allocation5] sm:$0xff] }
  0x18   :  { %117 = vmatpush.msra.mxu1 %v108_v11  ;;  %v60_v29 = vld [vmem:[#allocation2] sm:$0xff]  ;;  %v99_v30 = vld [vmem:[#allocation7 + $0x10] sm:$0xff]  ;;  %v98_v31 = vld [vmem:[#allocation7 + $0x8] sm:$0xff] }
  0x19   :  { %82 = vmatpush.msra.mxu0 %v71_v8  ;;  %v97_v32 = vld [vmem:[#allocation7] sm:$0xff] }
  0x1a   :  { %118 = vmatpush.msra.mxu1 %v107_v13 }
  0x1b   :  { %83 = vmatpush.msra.mxu0 %v70_v10 }
  0x1c   :  { %119 = vmatpush.msra.mxu1 %v106_v15 }
  0x1d   :  { %84 = vmatpush.msra.mxu0 %v69_v12 }
  0x1e   :  { %120 = vmatpush.msra.mxu1 %v105_v17 }
  0x1f   :  { %85 = vmatpush.msra.mxu0 %v68_v14 }
  0x20   :  { %121 = vmatpush.msra.mxu1 %v104_v19 }
  0x21   :  { %86 = vmatpush.msra.mxu0 %v67_v16 }
  0x22   :  { %122 = vmatpush.msra.mxu1 %v103_v21 }
  0x23   :  { %87 = vmatpush.msra.mxu0 %v66_v18 }
  0x24   :  { %123 = vmatpush.msra.mxu1 %v102_v23 }
  0x25   :  { %88 = vmatpush.msra.mxu0 %v65_v20 }
  0x26   :  { %124 = vmatpush.msra.mxu1 %v101_v25 }
  0x27   :  { %89 = vmatpush.msra.mxu0 %v64_v22 }
  0x28   :  { %125 = vmatpush.msra.mxu1 %v100_v27 }
  0x29   :  { %90 = vmatpush.msra.mxu0 %v63_v24 }
  0x2a   :  { %126 = vmatpush.msra.mxu1 %v99_v30 }
  0x2b   :  { %91 = vmatpush.msra.mxu0 %v62_v26 }
  0x2c   :  { %127 = vmatpush.msra.mxu1 %v98_v31 }
  0x2d   :  { %92 = vmatpush.msra.mxu0 %v61_v28 }
  0x2e   :  { %93 = vmatmul.f32.vlgmr.msra.gmra.mxu0 %v60_v29  ;;  %128 = vmatpush.msra.mxu1 %v97_v32 }
  0xab   :  { %v94_v33 = vpop.f32.mrf.mxu0 }
  0xac   :  { %129 = vmatmul.f32.vlgmr.msra.gmra.mxu1 %v94_v33 }
 0x129   :  { %v130_v34 = vpop.f32.mrf.mxu1 }
 0x12a   :  { %133 = vst [vmem:[#allocation8] sm:$0xff] %v130_v34 }
 0x12b   :  { %144 = dma.vmem_to_hbm [thread:$0]  %s140_s2, 128, %s142_s30, [#allocation4]  }
 0x12c   :  { %258 = dma.done.wait [#allocation4], 128  }
 0x12d   :  { %259 = vsyncadd [#allocation4], 4294967168 }
 0x12e   :  { %149 = vsyncpa [#allocation3], 1 }
 0x12f   :  { %150 = vsyncpa [#allocation6], 1 }
 0x130   :  { %151 = vsyncpa [#allocation4], 1 }

</bundles_post_ra>
